<compile_context>
chip_gen: v7x
topology: tpu7x:2x2x1
jax: 0.10.0
libtpu: 0.0.40
codegen_flags: <defaults>
</compile_context>

<pallas_src>
import functools

import jax
import jax.numpy as jnp
from jax.experimental import pallas as pl
from jax.experimental.pallas import tpu as pltpu


def _embeddings_kernel(eps, seq_len,
                       ids_smem,          # [B*S] int32, SMEM (scalar prefetch)
                       tok_ref,           # (1, TILE_S, 1) int32, VMEM
                       w_word_hbm,        # [V, H] f32, HBM (pl.ANY)
                       pos_ref,           # (TILE_S, H) f32, VMEM (direct slice of pos table)
                       tok_tbl_ref,       # (T, H) f32, VMEM (tiny, resident)
                       gamma_ref,         # (1, H) f32
                       beta_ref,          # (1, H) f32
                       out_ref,           # (1, TILE_S, H) f32
                       wrows,             # VMEM (TILE_S, H) f32 scratch (gathered word rows)
                       sems):             # DMA semaphores (TILE_S,)
    b = pl.program_id(0)
    j = pl.program_id(1)
    tile_s, _ = wrows.shape
    vocab = w_word_hbm.shape[0]
    base = b * seq_len + j * tile_s

    # 1) Issue the per-row word-embedding gathers (all DMAs in flight at once).
    @pl.loop(0, tile_s)
    def _issue(t):
        row = jnp.clip(ids_smem[base + t], 0, vocab - 1)   # guard OOB ids (torch would raise)
        pltpu.make_async_copy(w_word_hbm.at[pl.ds(row, 1), :],
                              wrows.at[pl.ds(t, 1), :],
                              sems.at[t]).start()

    # 2) While the gathers are in flight: positions come straight from the
    #    BlockSpec slice; token-type (T == 2) is a cheap VPU select (no MXU).
    tok = tok_ref[0]                       # (TILE_S, 1) int32
    emb = pos_ref[...]                     # (TILE_S, H) f32
    n_types = tok_tbl_ref.shape[0]
    tok_emb = jnp.broadcast_to(tok_tbl_ref[0:1, :], emb.shape)
    for t in range(1, n_types):            # static, tiny (T=2)
        tok_emb = jnp.where(tok == t, tok_tbl_ref[t:t + 1, :], tok_emb)
    emb = emb + tok_emb

    # 3) Wait for the gathered word rows and accumulate them.
    @pl.loop(0, tile_s)
    def _wait(t):
        pltpu.make_async_copy(w_word_hbm.at[pl.ds(0, 1), :],
                              wrows.at[pl.ds(t, 1), :],
                              sems.at[t]).wait()
    emb = emb + wrows[...]

    # 4) LayerNorm over H (biased variance, like torch) + affine.
    mean = jnp.mean(emb, axis=-1, keepdims=True)
    var = jnp.mean((emb - mean) ** 2, axis=-1, keepdims=True)
    normed = (emb - mean) * jax.lax.rsqrt(var + eps)
    out_ref[0] = normed * gamma_ref[...] + beta_ref[...]
    # TODO(synk): Dropout(p=hidden_dropout_prob) is identity in eval mode; training-mode
    # dropout with torch-identical RNG is omitted.
    # TODO(synk): position_embedding_type='traditional' (sinusoidal) path not implemented;
    # the module default 'absolute' path is what this kernel computes.


def bert_embeddings(inputs_ids, params, *, token_type_ids=None, eps=1e-12, tile_s=None):
    """inputs_ids: [B, S] int32.  Returns [B, S, H] float32."""
    B, S = inputs_ids.shape
    H = params["word"].shape[1]
    T = params["tok"].shape[0]
    P = params["pos"].shape[0]
    assert S <= P, "sequence longer than max_position_embeddings"

    if token_type_ids is None:
        token_type_ids = jnp.zeros((B, S), dtype=jnp.int32)

    if tile_s is None:
        tile_s = S if S <= 512 else 512
    if S % tile_s != 0:
        tile_s = S                        # fall back: one tile per sequence
    n_seq_tiles = S // tile_s

    ids_flat = inputs_ids.astype(jnp.int32).reshape(B * S)
    tok3d = token_type_ids.astype(jnp.int32).reshape(B, S, 1)

    kernel = functools.partial(_embeddings_kernel, float(eps), S)

    grid_spec = pltpu.PrefetchScalarGridSpec(
        num_scalar_prefetch=1,            # ids -> SMEM, drive the gather DMA addresses
        grid=(B, n_seq_tiles),
        in_specs=[
            pl.BlockSpec((1, tile_s, 1), lambda b, j, ids: (b, j, 0)),   # token_type ids
            pl.BlockSpec(memory_space=pl.ANY),                           # word table stays in HBM
            pl.BlockSpec((tile_s, H), lambda b, j, ids: (j, 0)),         # position rows (arange)
            pl.BlockSpec((T, H), lambda b, j, ids: (0, 0)),              # tiny token-type table
            pl.BlockSpec((1, H), lambda b, j, ids: (0, 0)),              # gamma (resident)
            pl.BlockSpec((1, H), lambda b, j, ids: (0, 0)),              # beta  (resident)
        ],
        out_specs=pl.BlockSpec((1, tile_s, H), lambda b, j, ids: (b, j, 0)),
        scratch_shapes=[
            pltpu.VMEM((tile_s, H), jnp.float32),
            pltpu.SemaphoreType.DMA((tile_s,)),
        ],
    )

    out = pl.pallas_call(
        kernel,
        out_shape=jax.ShapeDtypeStruct((B, S, H), jnp.float32),
        grid_spec=grid_spec,
        compiler_params=pltpu.CompilerParams(
            dimension_semantics=("parallel", "arbitrary")),
    )(ids_flat, tok3d,
      params["word"], params["pos"], params["tok"],
      params["gamma"].reshape(1, H), params["beta"].reshape(1, H))

    return out


def init_params(key, *, vocab_size, max_position_embeddings, type_vocab_size,
                hidden_size, pad_token_id=0):
    k1, k2, k3 = jax.random.split(key, 3)
    w_word = 0.02 * jax.random.normal(k1, (vocab_size, hidden_size), jnp.float32)
    # nn.Embedding(padding_idx=pad_token_id) zeroes the padding row at init.
    w_word = w_word.at[pad_token_id].set(0.0)
    w_pos = 0.02 * jax.random.normal(k2, (max_position_embeddings, hidden_size), jnp.float32)
    w_tok = 0.02 * jax.random.normal(k3, (type_vocab_size, hidden_size), jnp.float32)
    gamma = jnp.ones((hidden_size,), jnp.float32)   # nn.LayerNorm default init
    beta = jnp.zeros((hidden_size,), jnp.float32)
    return {"word": w_word, "pos": w_pos, "tok": w_tok, "gamma": gamma, "beta": beta}


def _reference(inputs_ids, params, token_type_ids=None, eps=1e-12):
    B, S = inputs_ids.shape
    pos = jnp.arange(S)
    if token_type_ids is None:
        token_type_ids = jnp.zeros((B, S), jnp.int32)
    emb = (params["word"][inputs_ids]
           + params["pos"][pos][None, :, :]
           + params["tok"][token_type_ids])
    mean = emb.mean(-1, keepdims=True)
    var = ((emb - mean) ** 2).mean(-1, keepdims=True)
    return (emb - mean) * jax.lax.rsqrt(var + eps) * params["gamma"] + params["beta"]


if __name__ == "__main__":
    # Small synthetic config (same structure as MyBertConfig, scaled down).
    VOCAB, MAX_POS, TYPE_VOCAB, HIDDEN = 64, 16, 2, 32
    B, S = 2, 8

    key = jax.random.PRNGKey(0)
    k_param, k_ids, k_tok = jax.random.split(key, 3)
    params = init_params(k_param, vocab_size=VOCAB,
                         max_position_embeddings=MAX_POS,
                         type_vocab_size=TYPE_VOCAB,
                         hidden_size=HIDDEN)

    inputs_ids = jax.random.randint(k_ids, (B, S), 0, VOCAB, dtype=jnp.int32)
    token_type_ids = jax.random.randint(k_tok, (B, S), 0, TYPE_VOCAB, dtype=jnp.int32)

    out = bert_embeddings(inputs_ids, params, token_type_ids=token_type_ids)
    out = jax.block_until_ready(out)

    ref = _reference(inputs_ids, params, token_type_ids)
    assert out.shape == (B, S, HIDDEN)
    assert jnp.allclose(out, ref, atol=1e-4, rtol=1e-4), "mismatch vs JAX reference"

    print("KERNEL_OK")
</pallas_src>

<mosaic_0001>
module attributes {stable_mosaic.version = 11 : i64} {
  func.func @_embeddings_kernel(%arg0: i32, %arg1: i32, %arg2: memref<16xi32, #tpu.memory_space<smem>>, %arg3: memref<1x8x1xi32, #tpu.memory_space<vmem>>, %arg4: memref<64x32xf32, #tpu.memory_space<any>>, %arg5: memref<8x32xf32, #tpu.memory_space<vmem>>, %arg6: memref<2x32xf32, #tpu.memory_space<vmem>>, %arg7: memref<1x32xf32, #tpu.memory_space<vmem>>, %arg8: memref<1x32xf32, #tpu.memory_space<vmem>>, %arg9: memref<1x8x32xf32, #tpu.memory_space<vmem>>, %arg10: memref<8x32xf32, #tpu.memory_space<vmem>>, %arg11: memref<8x!tpu.dma_semaphore, #tpu.memory_space<semaphore_mem>>) attributes {dimension_semantics = [#tpu.dimension_semantics<parallel>, #tpu.dimension_semantics<arbitrary>], iteration_bounds = array<i64: 2, 1>, scalar_prefetch = 1 : i64, scratch_operands = 2 : i64, tpu.core_type = #tpu.core_type<tc>, window_params = [{transform_indices = @transform_0, window_bounds = array<i64: 1, 8, 1>}, {}, {transform_indices = @transform_2, window_bounds = array<i64: 8, 32>}, {pipeline_mode = #tpu.pipeline_mode<synchronous>, transform_indices = @transform_3, window_bounds = array<i64: 2, 32>}, {pipeline_mode = #tpu.pipeline_mode<synchronous>, transform_indices = @transform_4, window_bounds = array<i64: 1, 32>}, {pipeline_mode = #tpu.pipeline_mode<synchronous>, transform_indices = @transform_5, window_bounds = array<i64: 1, 32>}, {transform_indices = @transform_6, window_bounds = array<i64: 1, 8, 32>}]} {
    %c8_i32 = arith.constant 8 : i32
    %0 = arith.muli %arg0, %c8_i32 : i32
    %c8_i32_0 = arith.constant 8 : i32
    %1 = arith.muli %arg1, %c8_i32_0 : i32
    %2 = arith.addi %0, %1 : i32
    %c0_i32 = arith.constant 0 : i32
    %c8_i32_1 = arith.constant 8 : i32
    %3 = arith.addi %c0_i32, %c8_i32_1 : i32
    %c1_i32 = arith.constant 1 : i32
    scf.for %arg12 = %c0_i32 to %3 step %c1_i32  : i32 {
      %c1_i32_28 = arith.constant 1 : i32
      %49 = arith.muli %arg12, %c1_i32_28 : i32
      %c0_i32_29 = arith.constant 0 : i32
      %50 = arith.addi %c0_i32_29, %49 : i32
      %51 = arith.addi %2, %50 : i32
      %52 = arith.index_cast %51 : i32 to index
      %53 = memref.load %arg2[%52] : memref<16xi32, #tpu.memory_space<smem>>
      %c0_i32_30 = arith.constant 0 : i32
      %c63_i32 = arith.constant 63 : i32
      %54 = arith.maxsi %c0_i32_30, %53 : i32
      %55 = arith.minsi %c63_i32, %54 : i32
      %c0_i32_31 = arith.constant 0 : i32
      %56 = tpu.memref_slice %arg4[%55, %c0_i32_31] : memref<64x32xf32, #tpu.memory_space<any>> -> memref<1x32xf32, #tpu.memory_space<any>>
      %c0_i32_32 = arith.constant 0 : i32
      %57 = tpu.memref_slice %arg10[%50, %c0_i32_32] : memref<8x32xf32, #tpu.memory_space<vmem>> -> memref<1x32xf32, #tpu.memory_space<vmem>>
      %58 = tpu.memref_slice %arg11[%50] : memref<8x!tpu.dma_semaphore, #tpu.memory_space<semaphore_mem>> -> memref<1x!tpu.dma_semaphore, #tpu.memory_space<semaphore_mem>>
      %59 = tpu.memref_squeeze %58 : memref<1x!tpu.dma_semaphore, #tpu.memory_space<semaphore_mem>> -> memref<!tpu.dma_semaphore, #tpu.memory_space<semaphore_mem>>
      tpu.enqueue_dma source(%56 : memref<1x32xf32, #tpu.memory_space<any>>) target(%57 : memref<1x32xf32, #tpu.memory_space<vmem>>) target_semaphore(%59 : memref<!tpu.dma_semaphore, #tpu.memory_space<semaphore_mem>>)
    }
    %c8_i32_2 = arith.constant 8 : i32
    %c0 = arith.constant 0 : index
    %c0_3 = arith.constant 0 : index
    %c0_4 = arith.constant 0 : index
    %4 = vector.load %arg3[%c0, %c0_3, %c0_4] : memref<1x8x1xi32, #tpu.memory_space<vmem>>, vector<1x8x1xi32>
    %5 = vector.shape_cast %4 : vector<1x8x1xi32> to vector<8x1xi32>
    %c0_5 = arith.constant 0 : index
    %c0_6 = arith.constant 0 : index
    %6 = vector.load %arg5[%c0_5, %c0_6] : memref<8x32xf32, #tpu.memory_space<vmem>>, vector<8x32xf32>
    %c0_7 = arith.constant 0 : index
    %c0_8 = arith.constant 0 : index
    %7 = vector.load %arg6[%c0_7, %c0_8] : memref<2x32xf32, #tpu.memory_space<vmem>>, vector<1x32xf32>
    %8 = vector.shape_cast %7 : vector<1x32xf32> to vector<1x32xf32>
    %9 = vector.broadcast %8 : vector<1x32xf32> to vector<8x32xf32>
    %c1_i32_9 = arith.constant 1 : i32
    %10 = vector.broadcast %c1_i32_9 : i32 to vector<8x1xi32>
    %11 = arith.cmpi eq, %5, %10 : vector<8x1xi32>
    %c1 = arith.constant 1 : index
    %c0_10 = arith.constant 0 : index
    %12 = vector.load %arg6[%c1, %c0_10] : memref<2x32xf32, #tpu.memory_space<vmem>>, vector<1x32xf32>
    %13 = vector.shape_cast %11 : vector<8x1xi1> to vector<8x1xi1>
    %14 = vector.broadcast %13 : vector<8x1xi1> to vector<8x32xi1>
    %15 = vector.shape_cast %12 : vector<1x32xf32> to vector<1x32xf32>
    %16 = vector.broadcast %15 : vector<1x32xf32> to vector<8x32xf32>
    %17 = arith.select %14, %16, %9 : vector<8x32xi1>, vector<8x32xf32>
    %18 = arith.addf %6, %17 : vector<8x32xf32>
    %c0_i32_11 = arith.constant 0 : i32
    %c8_i32_12 = arith.constant 8 : i32
    %19 = arith.addi %c0_i32_11, %c8_i32_12 : i32
    %c1_i32_13 = arith.constant 1 : i32
    scf.for %arg12 = %c0_i32_11 to %19 step %c1_i32_13  : i32 {
      %c1_i32_28 = arith.constant 1 : i32
      %49 = arith.muli %arg12, %c1_i32_28 : i32
      %c0_i32_29 = arith.constant 0 : i32
      %50 = arith.addi %c0_i32_29, %49 : i32
      %c0_i32_30 = arith.constant 0 : i32
      %c0_i32_31 = arith.constant 0 : i32
      %51 = tpu.memref_slice %arg4[%c0_i32_30, %c0_i32_31] : memref<64x32xf32, #tpu.memory_space<any>> -> memref<1x32xf32, #tpu.memory_space<any>>
      %c0_i32_32 = arith.constant 0 : i32
      %52 = tpu.memref_slice %arg10[%50, %c0_i32_32] : memref<8x32xf32, #tpu.memory_space<vmem>> -> memref<1x32xf32, #tpu.memory_space<vmem>>
      %53 = tpu.memref_slice %arg11[%50] : memref<8x!tpu.dma_semaphore, #tpu.memory_space<semaphore_mem>> -> memref<1x!tpu.dma_semaphore, #tpu.memory_space<semaphore_mem>>
      %54 = tpu.memref_squeeze %53 : memref<1x!tpu.dma_semaphore, #tpu.memory_space<semaphore_mem>> -> memref<!tpu.dma_semaphore, #tpu.memory_space<semaphore_mem>>
      tpu.wait_dma2 semaphore(%54 : memref<!tpu.dma_semaphore, #tpu.memory_space<semaphore_mem>>) src(%51 : memref<1x32xf32, #tpu.memory_space<any>>) dst(%52 : memref<1x32xf32, #tpu.memory_space<vmem>>)
    }
    %c8_i32_14 = arith.constant 8 : i32
    %c0_15 = arith.constant 0 : index
    %c0_16 = arith.constant 0 : index
    %20 = vector.load %arg10[%c0_15, %c0_16] : memref<8x32xf32, #tpu.memory_space<vmem>>, vector<8x32xf32>
    %21 = arith.addf %18, %20 : vector<8x32xf32>
    %cst = arith.constant dense<0.000000e+00> : vector<8xf32>
    %22 = vector.multi_reduction <add>, %21, %cst [1] : vector<8x32xf32> to vector<8xf32>
    %23 = vector.shape_cast %22 : vector<8xf32> to vector<8x1xf32>
    %cst_17 = arith.constant 3.200000e+01 : f32
    %24 = vector.broadcast %cst_17 : f32 to vector<8x1xf32>
    %25 = arith.divf %23, %24 : vector<8x1xf32>
    %26 = vector.broadcast %25 : vector<8x1xf32> to vector<8x32xf32>
    %27 = arith.subf %21, %26 : vector<8x32xf32>
    %28 = arith.mulf %27, %27 : vector<8x32xf32>
    %cst_18 = arith.constant dense<0.000000e+00> : vector<8xf32>
    %29 = vector.multi_reduction <add>, %28, %cst_18 [1] : vector<8x32xf32> to vector<8xf32>
    %30 = vector.shape_cast %29 : vector<8xf32> to vector<8x1xf32>
    %cst_19 = arith.constant 3.200000e+01 : f32
    %31 = vector.broadcast %cst_19 : f32 to vector<8x1xf32>
    %32 = arith.divf %30, %31 : vector<8x1xf32>
    %33 = vector.broadcast %25 : vector<8x1xf32> to vector<8x32xf32>
    %34 = arith.subf %21, %33 : vector<8x32xf32>
    %cst_20 = arith.constant 9.99999996E-13 : f32
    %35 = vector.broadcast %cst_20 : f32 to vector<8x1xf32>
    %36 = arith.addf %32, %35 : vector<8x1xf32>
    %37 = math.rsqrt %36 : vector<8x1xf32>
    %38 = vector.broadcast %37 : vector<8x1xf32> to vector<8x32xf32>
    %39 = arith.mulf %34, %38 : vector<8x32xf32>
    %c0_21 = arith.constant 0 : index
    %c0_22 = arith.constant 0 : index
    %40 = vector.load %arg7[%c0_21, %c0_22] : memref<1x32xf32, #tpu.memory_space<vmem>>, vector<1x32xf32>
    %41 = vector.broadcast %40 : vector<1x32xf32> to vector<8x32xf32>
    %42 = arith.mulf %39, %41 : vector<8x32xf32>
    %c0_23 = arith.constant 0 : index
    %c0_24 = arith.constant 0 : index
    %43 = vector.load %arg8[%c0_23, %c0_24] : memref<1x32xf32, #tpu.memory_space<vmem>>, vector<1x32xf32>
    %44 = vector.broadcast %43 : vector<1x32xf32> to vector<8x32xf32>
    %45 = arith.addf %42, %44 : vector<8x32xf32>
    %c0_25 = arith.constant 0 : index
    %c0_26 = arith.constant 0 : index
    %c0_27 = arith.constant 0 : index
    %46 = vector.load %arg9[%c0_25, %c0_26, %c0_27] : memref<1x8x32xf32, #tpu.memory_space<vmem>>, vector<1x8x32xf32>
    %47 = vector.shape_cast %46 : vector<1x8x32xf32> to vector<8x32xf32>
    %48 = vector.shape_cast %45 : vector<8x32xf32> to vector<1x8x32xf32>
    tpu.vector_store %arg9[%c0_25, %c0_26, %c0_27], %48 {strides = array<i32>} : memref<1x8x32xf32, #tpu.memory_space<vmem>>, vector<1x8x32xf32>,
    return
  }
  func.func @transform_0(%arg0: i32, %arg1: i32, %arg2: memref<16xi32, #tpu.memory_space<smem>>) -> (i32, i32, i32) {
    %c0_i32 = arith.constant 0 : i32
    %c0_i32_0 = arith.constant 0 : i32
    return %arg0, %arg1, %c0_i32 : i32, i32, i32
  }
  func.func @transform_2(%arg0: i32, %arg1: i32, %arg2: memref<16xi32, #tpu.memory_space<smem>>) -> (i32, i32) {
    %c0_i32 = arith.constant 0 : i32
    %c0_i32_0 = arith.constant 0 : i32
    return %arg1, %c0_i32 : i32, i32
  }
  func.func @transform_3(%arg0: i32, %arg1: i32, %arg2: memref<16xi32, #tpu.memory_space<smem>>) -> (i32, i32) {
    %c0_i32 = arith.constant 0 : i32
    %c0_i32_0 = arith.constant 0 : i32
    %c0_i32_1 = arith.constant 0 : i32
    return %c0_i32, %c0_i32_0 : i32, i32
  }
  func.func @transform_4(%arg0: i32, %arg1: i32, %arg2: memref<16xi32, #tpu.memory_space<smem>>) -> (i32, i32) {
    %c0_i32 = arith.constant 0 : i32
    %c0_i32_0 = arith.constant 0 : i32
    %c0_i32_1 = arith.constant 0 : i32
    return %c0_i32, %c0_i32_0 : i32, i32
  }
  func.func @transform_5(%arg0: i32, %arg1: i32, %arg2: memref<16xi32, #tpu.memory_space<smem>>) -> (i32, i32) {
    %c0_i32 = arith.constant 0 : i32
    %c0_i32_0 = arith.constant 0 : i32
    %c0_i32_1 = arith.constant 0 : i32
    return %c0_i32, %c0_i32_0 : i32, i32
  }
  func.func @transform_6(%arg0: i32, %arg1: i32, %arg2: memref<16xi32, #tpu.memory_space<smem>>) -> (i32, i32, i32) {
    %c0_i32 = arith.constant 0 : i32
    %c0_i32_0 = arith.constant 0 : i32
    return %arg0, %arg1, %c0_i32 : i32, i32, i32
  }
}

</mosaic_0001>

<bundles_post_ra>
// kernel: tpu_custom_call.1
= control target key start
LH: loop header
LB: loop body
LE: loop exit
PB: predicated region body
PF: predicated region fallthrough
CT: control target
= control target key end

     0   :  { %s987_s0 = inlined_call_operand.vmem [shape: s32[16], index: 0, kind: input, shape index: {}]   ;;  %s988_s1 = inlined_call_operand.vmem [shape: s32[2,8,1], index: 1, kind: input, shape index: {}]   ;;  %s989_s2 = inlined_call_operand.vmem [shape: f32[64,32], index: 2, kind: input, shape index: {}]   ;;  %s990_s3 = inlined_call_operand.vmem [shape: f32[16,32], index: 3, kind: input, shape index: {}]   ;;  %s991_s4 = inlined_call_operand.vmem [shape: f32[2,32], index: 4, kind: input, shape index: {}]   ;;  %s992_s5 = inlined_call_operand.vmem [shape: f32[1,32], index: 5, kind: input, shape index: {}]   ;;  %s993_s6 = inlined_call_operand.vmem [shape: f32[1,32], index: 6, kind: input, shape index: {}]   ;;  %s994_s7 = inlined_call_operand.hbm [shape: f32[2,8,32], index: 7, kind: output, shape index: {}]  }
   0x1   :  { %s12_s26 = sshll.u32 %s987_s0, 4  ;;  %s13_s26 = int_to_ptr.vmem [resolvable:$true] %s12_s26 }
   0x2   :  { %s684_s27 = scalar_lea.vmem %s13_s26, 16  ;;  %p689_p1 = scmp.lt.s32.totalorder %s13_s26, %s13_s26 }
   0x3   :  { %p685_p0 = scmp.ne.s32.totalorder %s13_s26, %s684_s27  ;;  %p690_p2 = scmp.lt.s32.totalorder %s684_s27, %s684_s27 }
   0x5   :  { %p691_p3 = por %p690_p2, %p689_p1 }
   0x7   :  { %p692_p4 = pnand %p691_p3, %p685_p0 }
   0x9   :  { %695 = shalt.err (!%p692_p4)  }
   0xa   :  { %s796_s28 = smov [#allocation5]  }
   0xb   :  { %15 = dma.vmem_to_smem %s13_s26, 16, %s796_s28, [#allocation4] }
   0xc   :  { %756 = dma.done.wait [#allocation4], 16 }
   0xd   :  { %757 = vsyncadd [#allocation4], 4294967280 }
   0xe   :  { %17 = sfence }
   0xf   :  { %18 = vsyncpa [#allocation7], 0 }
  0x10   :  { %20 = vsyncpa [#allocation7 + $0x1], 0  ;;  %s842_s29 = smov 0   ;;  %s844_s30 = smov 0  }
  0x11   :  { %s846_s0 = smov 0   ;;  %s848_s8 = smov 0  }
  0x12   :  { %s850_s9 = smov 0   ;;  %s852_s10 = smov 0  }
  0x13 LB: > { %s576_s11 = sadd.s32 4294967295, %s786_s10   ;;  %s577_s12 = sadd.s32 4294967294, %s786_s10   ;;  %s786_s10 = sphi %s852_s10, %s26_s10   ;;  %s782_s9 = sphi %s850_s9, %s1003_s9   ;;  %s778_s8 = sphi %s848_s8, %s1002_s8   ;;  %s774_s0 = sphi %s846_s0, %s1001_s0   ;;  %s770_s30 = sphi %s844_s30, %s1000_s30   ;;  %s766_s29 = sphi %s842_s29, %s999_s29  }
  0x14   : > { %s38_s13 = sadd.s32 1, %s782_s9  ;;  %s164_s14 = sadd.s32 1, %s774_s0 }
  0x15   : > { %p40_p5 = scmp.ge.s32.totalorder %s38_s13, 2  ;;  %p174_p6 = scmp.ne.s32.totalorder %s774_s0, %s770_s30 }
  0x16   : > { %p175_p7 = scmp.eq.s32.totalorder %s576_s11, 1  ;;  %p180_p8 = scmp.ne.s32.totalorder %s770_s30, %s766_s29 }
  0x17   : > { %s1005_s13 = smov (%p40_p5, %s38_s13), 0  ;;  %p181_p10 = scmp.eq.s32.totalorder %s577_s12, 1 }
  0x18   : > { %p882_p9 = por %p175_p7, %p174_p6  ;;  %s159_s16 = ssub.s32 %s782_s9, %s1005_s13 }
  0x19   : > { %p581_p11 = scmp.ge.s32.totalorder %s786_s10, 1  ;;  %p162_p12 = scmp.eq.s32.totalorder %s159_s16, 0 }
  0x1a   : > { %p889_p13 = por %p181_p10, %p180_p8  ;;  %p225_p0 = scmp.lt.s32.totalorder %s786_s10, 3 }
  0x1b   : > { %s895_s18 = scalar_select %p162_p12, %s774_s0, %s164_s14  }
  0x1c   : > { %p226_p1 = pnand %p581_p11, %p225_p0 }
  0x1d   : > { %s995_s19 = sand.u32 (!%p226_p1), 1, %s770_s30   ;;  %p259_p2 = scmp.lt.s32.totalorder (!%p226_p1), %s778_s8, 1 }
  0x1e   : > { %229 = sbr.rel (%p226_p1) target bundleno = 525 (0x20d), region = 40  ;;  %s901_s20 = sshll.u32 (!%p226_p1), %s995_s19, 3 }
  0x1f   : > { %s584_s21 = sshll.u32 (!%p226_p1), %s778_s8, 3  ;;  %s258_s27 = scalar_lea.vmem (!%p226_p1), [#allocation6], %s901_s20 }
  0x20   : > { %s788_s28 = smov (!%p226_p1), 0  }
  0x25   : > { %s260_s22 = scalar_select %p259_p2, %s778_s8, 1 }
  0x27   : > { %s583_s23 = sshll.u32 %s260_s22, 3 }
  0x28   : > { %s265_s26 = scalar_lea.vmem %s988_s1, %s583_s23 }
  0x29 LB: >> { %s279_s11 = sadd.s32 %s790_s28, %s584_s21  ;;  %s286_s22 = scalar_lea.vmem [#allocation2], %s790_s28  ;;  %s790_s28 = sphi %s788_s28, %s278_s28  }
  0x2a   : >> { %s280_s12 = sld [smem:[#allocation5 + %s279_s11]]  ;;  %s287_s24 = scalar_lea.sflag [#allocation3], %s790_s28 }
  0x30   : >> { %p281_p3 = scmp.gt.s32.totalorder %s280_s12, 0  ;;  %p585_p4 = scmp.lt.s32.totalorder %s280_s12, 63 }
  0x32   : >> { %s1007_s12 = smov (!%p281_p3, %s280_s12), 0 }
  0x33   : >> { %s1009_s12 = smov (!%p585_p4, %s1007_s12), 63 }
  0x34   : >> { %s285_s19 = scalar_lea.vmem %s989_s2, %s1009_s12 }
  0x35   : >> { %v305_v0 = vld [vmem:[%s285_s19] sm:$0x1] }
  0x36   : >> { %306 = vst [vmem:[%s286_s22] sm:$0x1] %v305_v0 }
  0x37   : >> { %331 = vsyncadd %s287_s24, 16  ;;  %s278_s28 = sadd.s32 1, %s790_s28  }
  0x38   : >> { %p275_p5 = scmp.ge.s32.totalorder %s278_s28, 8  }
  0x39   : > { %v332_v1 = vld [vmem:[%s265_s26] sm:$0xff] (%p275_p5)  ;;  %v797_v2 = vmov (%p275_p5), 0   ;;  %s792_s21 = smov (%p275_p5), 0  }
  0x3a   : > { %277 = sbr.rel (!%p275_p5) target bundleno = 41 (0x29), region = 143  ;;  %681 = vset.pattern.permute.xlu0 (%p275_p5), %v797_v2  ;;  %vm339_vm0 = vcmp.eq.s32.totalorder (%p275_p5), %v332_v1, 1  ;;  %v590_v4 = vld [vmem:[%s991_s4] ss:$0 sm:$0xff] (%p275_p5)  ;;  %v591_v5 = vld [vmem:[%s991_s4 + $0x1] ss:$0 sm:$0xff] (%p275_p5) }
  0x3b   : > { %v341_v3 = vsel (%p275_p5), %vm339_vm0, 1, %v797_v2  ;;  %v333_v6 = vld [vmem:[%s990_s3] sm:$0xff] (%p275_p5) }
  0x3c   : > { %343 = vperm.xlu0 (%p275_p5), %681, %v341_v3  }
  0xbb   : > { %v344_v7 = vpop.permute.xlu0 %343 }
  0xbc   : > { %vm345_vm1 = vcmp.eq.s32.totalorder %v344_v7, 1 }
  0xbd   : > { %v350_v8 = vsel %vm345_vm1, %v591_v5, %v590_v4 }
  0xbe   : > { %v351_v9 = vadd.f32 %v350_v8, %v333_v6 }
  0xbf LB: >> { %s358_s26 = scalar_lea.sflag [#allocation3], %s794_s21  ;;  %s794_s21 = sphi %s792_s21, %s357_s21  }
  0xc0   : >> { %758 = dma.done.wait %s358_s26, 16 }
  0xc1   : >> { %759 = vsyncadd %s358_s26, 4294967280  ;;  %s357_s21 = sadd.s32 1, %s794_s21  }
  0xc2   : >> { %p354_p6 = scmp.ge.s32.totalorder %s357_s21, 8  }
  0xc3   : > { %v362_v10 = vld [vmem:[#allocation2] sm:$0xff] (%p354_p6)  ;;  %vm364_vm2 = vcmask (%p354_p6), 261120   ;;  %s595_s23 = sshll.u32 (%p354_p6), %s778_s8, 7  ;;  %s411_s25 = sshll.u32 (%p354_p6), %s258_s27, 4  ;;  %s937_s25 = int_to_ptr.vmem [resolvable:$true] %s411_s25 }
  0xc4   : > { %356 = sbr.rel (!%p354_p6) target bundleno = 191 (0xbf), region = 154  ;;  %v363_v11 = vadd.f32 (%p354_p6), %v362_v10, %v351_v9  ;;  %v592_v22 = vld [vmem:[%s992_s5] ss:$0 sm:$0xff] (%p354_p6)  ;;  %s935_s12 = scalar_lea.hbm (%p354_p6), %s994_s7, %s595_s23 }
  0xc5   : > { %v593_v24 = vld [vmem:[%s993_s6] ss:$0 sm:$0xff] (%p354_p6)  ;;  %s998_s14 = sand.u32 (%p354_p6), 1, %s770_s30   ;;  %s696_s8 = scalar_lea.vmem (%p354_p6), %s937_s25, 128 }
  0xc6   : > { %v365_v12 = vsel (%p354_p6), %vm364_vm2, %v363_v11, 0.0  ;;  %s397_s21 = scalar_lea.sflag (%p354_p6), [#allocation7], %s998_s14  ;;  %p697_p7 = scmp.ne.s32.totalorder (%p354_p6), %s937_s25, %s696_s8 }
  0xc7   : > { %366 = vadd.xlane.f32.xlu0 (%p354_p6), %v365_v12  ;;  %s798_s26 = smov (%p354_p6), [#allocation6]  }
  0xc8   : > { %p698_p8 = pnand (%p354_p6), %p697_p7, %p882_p9  ;;  %s700_s28 = sshll.u32 (%p354_p6), %s798_s26, 4  ;;  %s701_s28 = int_to_ptr.vmem [resolvable:$false] %s700_s28 }
  0xc9   : > { %s702_s16 = scalar_lea.vmem (%p354_p6), %s701_s28, 256  ;;  %p703_p11 = scmp.lt.s32.totalorder (%p354_p6), %s937_s25, %s701_s28 }
  0xca   : > { %p699_p10 = pneg (%p354_p6), %p698_p8  ;;  %p704_p12 = scmp.lt.s32.totalorder (%p354_p6), %s702_s16, %s696_s8 }
  0xcc   : > { %p705_p0 = por %p704_p12, %p703_p11 }
  0xce   : > { %p706_p1 = pnand %p705_p0, %p699_p10 }
 0x154   : > { %v367_v13 = vpop.xlane.xlu0 %366 }
 0x155   : > { %v369_v14 = vmul.f32 0.03125, %v367_v13 }
 0x157   : > { %v370_v15 = vsub.f32 %v363_v11, %v369_v14 }
 0x159   : > { %v371_v16 = vmul.f32 %v370_v15, %v370_v15 }
 0x15b   : > { %v372_v17 = vsel %vm364_vm2, %v371_v16, 0.0 }
 0x15c   : > { %373 = vadd.xlane.f32.xlu0 %v372_v17 }
 0x1e9   : > { %v374_v18 = vpop.xlane.xlu0 %373 }
 0x1ea   : > { %v375_v19 = vmul.f32 0.03125, %v374_v18 }
 0x1ec   : > { %v376_v20 = vadd.f32 1e-12, %v375_v19 }
 0x1ee   : > { %682 = vrsqrt.f32 %v376_v20 }
 0x1f8   : > { %v683_v21 = vpop.eup %682 }
 0x1f9   : > { %v378_v23 = vmul.f32 %v683_v21, %v370_v15 }
 0x1fb   : > { %v386_v25 = vmul.f32 %v592_v22, %v378_v23 }
 0x1fd   : > { %v394_v26 = vadd.f32 %v593_v24, %v386_v25 }
 0x1ff   : > { %395 = vst.msk [vmem:[%s258_s27] sm:$0xff] %vm364_vm2, %v394_v26 }
 0x200   : > { %709 = shalt.err (!%p706_p1)
}
 0x201   : > { %s710_s20 = scalar_lea.hbm %s935_s12, 128  ;;  %s714_s24 = scalar_lea.hbm %s994_s7, 256 }
 0x202   : > { %p711_p2 = scmp.ne.s32.totalorder %s935_s12, %s710_s20  ;;  %p715_p5 = scmp.lt.u32.totalorder %s935_s12, %s994_s7 }
 0x203   : > { %p716_p6 = scmp.lt.u32.totalorder %s714_s24, %s710_s20  ;;  %p718_p8 = scmp.lt.u32.totalorder %s710_s20, %s935_s12 }
 0x204   : > { %p712_p3 = pnand %p711_p2, %p882_p9 }
 0x205   : > { %p717_p7 = por %p716_p6, %p715_p5 }
 0x206   : > { %p713_p4 = pneg %p712_p3 }
 0x207   : > { %p719_p10 = por %p718_p8, %p717_p7 }
 0x209   : > { %p720_p11 = pnand %p719_p10, %p713_p4 }
 0x20b   : > { %723 = shalt.err (!%p720_p11)
}
 0x20c   : > { %608 = dma.vmem_to_hbm [thread:$0]  (%p882_p9), %s937_s25, 128, %s935_s12, %s397_s21  }
 0x20d PF: > { %p614_p12 = scmp.ge.s32.totalorder %s786_s10, 2  ;;  %s423_s19 = sand.u32 1, %s766_s29  }
 0x20e   : > { %s424_s14 = scalar_lea.sflag [#allocation7], %s423_s19 }
 0x20f   : > { %p611_p0 = pnand %p614_p12, %p889_p13 }
 0x211   : > { %761 = dma.done.wait (!%p611_p0), %s424_s14, 128  }
 0x212   : > { %763 = vsyncadd (!%p611_p0), %s424_s14, 4294967168  ;;  %s26_s10 = sadd.s32 1, %s786_s10   ;;  %s999_s29 = smov %s770_s30 }
 0x213   : > { %p23_p1 = scmp.ge.s32.totalorder %s26_s10, 4   ;;  %s1000_s30 = smov %s774_s0 }
 0x214   : > { %s1001_s0 = smov %s895_s18  ;;  %s1002_s8 = smov %s782_s9 }
 0x215   : > { %s1003_s9 = smov %s1005_s13  ;;  %25 = sbr.rel (!%p23_p1) target bundleno = 19 (0x13), region = 165 }
 0x21c   :  { %429 = vsyncpa [#allocation7], 1 }
 0x21d   :  { %431 = vsyncpa [#allocation7 + $0x1], 1 }
 0x21e   :  { %432 = vsyncmov [#allocation3] }
 0x221   :  { %s433_s15 = vpop.sfrf %432 }
 0x222   :  { %p598_p9 = scmp.ne.s32.totalorder %s433_s15, 0 }
 0x224   :  { %437 = shalt.err (%p598_p9)  }
 0x225   :  { %439 = vsyncmov [#allocation3 + $0x1] }
 0x228   :  { %s440_s17 = vpop.sfrf %439 }
 0x229   :  { %p599_p13 = scmp.ne.s32.totalorder %s440_s17, 0 }
 0x22b   :  { %444 = shalt.err (%p599_p13)  }
 0x22c   :  { %446 = vsyncmov [#allocation3 + $0x2] }
 0x22f   :  { %s447_s25 = vpop.sfrf %446 }
 0x230   :  { %p600_p2 = scmp.ne.s32.totalorder %s447_s25, 0 }
 0x232   :  { %451 = shalt.err (%p600_p2)  }
 0x233   :  { %453 = vsyncmov [#allocation3 + $0x3] }
 0x236   :  { %s454_s18 = vpop.sfrf %453 }
 0x237   :  { %p601_p3 = scmp.ne.s32.totalorder %s454_s18, 0 }
 0x239   :  { %458 = shalt.err (%p601_p3)  }
 0x23a   :  { %460 = vsyncmov [#allocation3 + $0x4] }
 0x23d   :  { %s461_s10 = vpop.sfrf %460 }
 0x23e   :  { %p602_p4 = scmp.ne.s32.totalorder %s461_s10, 0 }
 0x240   :  { %465 = shalt.err (%p602_p4)  }
 0x241   :  { %467 = vsyncmov [#allocation3 + $0x5] }
 0x244   :  { %s468_s1 = vpop.sfrf %467 }
 0x245   :  { %p603_p5 = scmp.ne.s32.totalorder %s468_s1, 0 }
 0x247   :  { %472 = shalt.err (%p603_p5)  }
 0x248   :  { %474 = vsyncmov [#allocation3 + $0x6] }
 0x24b   :  { %s475_s2 = vpop.sfrf %474 }
 0x24c   :  { %p604_p6 = scmp.ne.s32.totalorder %s475_s2, 0 }
 0x24e   :  { %479 = shalt.err (%p604_p6)  }
 0x24f   :  { %481 = vsyncmov [#allocation3 + $0x7] }
 0x252   :  { %s482_s3 = vpop.sfrf %481 }
 0x253   :  { %p605_p7 = scmp.ne.s32.totalorder %s482_s3, 0 }
 0x255   :  { %486 = shalt.err (%p605_p7)  }

</bundles_post_ra>
